<compile_context>
chip_gen: v7x
topology: tpu7x:2x2x1
jax: 0.10.0
libtpu: 0.0.40
codegen_flags: <defaults>
</compile_context>

<pallas_src>
import functools

import jax
import jax.numpy as jnp
from jax.experimental import pallas as pl
from jax.experimental.pallas import tpu as pltpu


def _round_up(x, m):
    return ((x + m - 1) // m) * m


def _posenc_kernel(coords_ref, o_ref, *, bands, include_input):
    """One column-tile of positional encoding, channel-major layout.

    coords_ref: (D, tile)        f32 VMEM  -- N rows live on the 128-lane axis
    o_ref:      (out_dim, tile)  f32 VMEM, out_dim = [D +] 2 * F * D
    """
    coords = coords_ref[...]                                # (D, tile), lane-dense

    # Frequency expansion: winded[f*D + d, :] = coords[d, :] * bands[f].
    # Bands are compile-time Python floats -> pure scalar * vreg VPU multiplies,
    # no MXU, no extra input operand.
    winded = jnp.concatenate([coords * b for b in bands], axis=0)   # (F*D, tile)

    # One sin and one cos over the dense (F*D, tile) slab instead of 2*F calls
    # on (D, tile) slivers (sublane-dense transcendental work).
    sin_w = jnp.sin(winded)
    cos_w = jnp.cos(winded)

    parts = ([coords] if include_input else []) + [sin_w, cos_w]
    # Single full-block, full-128-lane-width store.
    o_ref[...] = jnp.concatenate(parts, axis=0)              # (out_dim, tile)


class PositionalEmbedderPallas:
    """JAX/Pallas equivalent of wisp.models.embedders.PositionalEmbedder."""

    def __init__(self, num_freq, max_freq_log2, log_sampling=True,
                 include_input=True, input_dim=3):
        self.num_freq = num_freq
        self.max_freq_log2 = max_freq_log2
        self.log_sampling = log_sampling
        self.include_input = include_input
        self.input_dim = input_dim

        if log_sampling:
            bands = 2.0 ** jnp.linspace(0.0, float(max_freq_log2),
                                        num_freq, dtype=jnp.float32)
        else:
            bands = jnp.linspace(1.0, 2.0 ** max_freq_log2,
                                 num_freq, dtype=jnp.float32)
        self.bands = bands                                # (F,) f32, reference use
        # Baked into the kernel as compile-time scalars (exact f32 values).
        self._bands_py = tuple(float(b) for b in bands)

        self.out_dim = 2 * num_freq * input_dim
        if include_input:
            self.out_dim += input_dim

    def __call__(self, coords, *, tile_n=32768):
        """coords: (N, input_dim) -> (N, out_dim) float32."""
        N, D = coords.shape
        assert D == self.input_dim
        coords = coords.astype(jnp.float32)

        # Channel-major view: (D, N).  N maps to the 128-lane axis inside the
        # kernel, so the lane tile must be a multiple of 128.  Pad N up in the
        # wrapper so any N works (at most one extra padded grid step).
        coords_t = coords.T                               # (D, N)
        tile = _round_up(min(tile_n, _round_up(N, 128)), 128)
        n_pad = _round_up(N, tile)
        if n_pad != N:
            coords_t = jnp.pad(coords_t, ((0, 0), (0, n_pad - N)))

        kernel = functools.partial(
            _posenc_kernel,
            bands=self._bands_py,
            include_input=self.include_input,
        )

        fd = self.num_freq * self.input_dim
        cost = pl.CostEstimate(
            flops=n_pad * fd,                             # band multiplies
            transcendentals=2 * n_pad * fd,               # sin + cos
            bytes_accessed=n_pad * (D + self.out_dim) * 4,
        )

        out_cm = pl.pallas_call(
            kernel,
            out_shape=jax.ShapeDtypeStruct((self.out_dim, n_pad), jnp.float32),
            grid_spec=pltpu.PrefetchScalarGridSpec(
                num_scalar_prefetch=0,
                grid=(n_pad // tile,),
                # Sub-8 / sub-128 leading dims are legal because they equal the
                # full array extent (D and out_dim); the lane axis is 128-aligned.
                in_specs=[pl.BlockSpec((D, tile), lambda i: (0, i))],
                out_specs=pl.BlockSpec((self.out_dim, tile), lambda i: (0, i)),
            ),
            compiler_params=pltpu.CompilerParams(
                # 1-D parallel grid: shards across both TensorCores on v7x,
                # neutral on v5e/v6e.
                dimension_semantics=("parallel",),
                # Headroom for 32K-64K lane tiles, double-buffered
                # (<= ~15 MiB at tile=65536); also lifts v5e above its 16 MiB
                # default scoped limit while staying well inside v7x's 64 MiB.
                vmem_limit_bytes=32 * 1024 * 1024,
            ),
            cost_estimate=cost,
        )(coords_t)

        # One XLA transpose back to the PyTorch (N, out_dim) row-major layout.
        out = out_cm.T
        return out[:N] if n_pad != N else out


def _reference(coords, bands, include_input):
    """Plain-JAX transcription of the PyTorch forward for verification."""
    N, D = coords.shape
    F = bands.shape[0]
    winded = (coords[:, None, :] * bands[None, :, None]).reshape(N, F * D)
    encoded = jnp.concatenate([jnp.sin(winded), jnp.cos(winded)], axis=-1)
    if include_input:
        encoded = jnp.concatenate([coords, encoded], axis=-1)
    return encoded


if __name__ == "__main__":
    num_freq = 4
    max_freq_log2 = 3
    input_dim = 3

    embedder = PositionalEmbedderPallas(num_freq, max_freq_log2,
                                        log_sampling=True,
                                        include_input=True,
                                        input_dim=input_dim)

    # Main check.
    key = jax.random.PRNGKey(0)
    N = 128
    coords = jax.random.uniform(key, (N, input_dim), dtype=jnp.float32,
                                minval=-1.0, maxval=1.0)
    out = jax.block_until_ready(embedder(coords))
    ref = _reference(coords, embedder.bands, include_input=True)
    assert out.shape == (N, embedder.out_dim)
    assert jnp.allclose(out, ref, atol=1e-5, rtol=1e-5), "mismatch vs reference"

    # Ragged-N check (exercises the padded-tail path).
    N2 = 50
    coords2 = jax.random.uniform(jax.random.PRNGKey(1), (N2, input_dim),
                                 dtype=jnp.float32, minval=-1.0, maxval=1.0)
    out2 = jax.block_until_ready(embedder(coords2))
    ref2 = _reference(coords2, embedder.bands, include_input=True)
    assert out2.shape == (N2, embedder.out_dim)
    assert jnp.allclose(out2, ref2, atol=1e-5, rtol=1e-5), "mismatch (ragged N)"

    # Exclude-input variant check.
    embedder_noinp = PositionalEmbedderPallas(num_freq, max_freq_log2,
                                              log_sampling=True,
                                              include_input=False,
                                              input_dim=input_dim)
    out3 = jax.block_until_ready(embedder_noinp(coords))
    ref3 = _reference(coords, embedder_noinp.bands, include_input=False)
    assert out3.shape == (N, embedder_noinp.out_dim)
    assert jnp.allclose(out3, ref3, atol=1e-5, rtol=1e-5), "mismatch (no input)"

    print("KERNEL_OK")
</pallas_src>

<mosaic_0001>
module attributes {stable_mosaic.version = 11 : i64} {
  func.func @_posenc_kernel(%arg0: i32, %arg1: memref<3x128xf32, #tpu.memory_space<vmem>>, %arg2: memref<27x128xf32, #tpu.memory_space<vmem>>) attributes {dimension_semantics = [#tpu.dimension_semantics<parallel>], iteration_bounds = array<i64: 1>, scalar_prefetch = 0 : i64, scratch_operands = 0 : i64, tpu.core_type = #tpu.core_type<tc>, window_params = [{transform_indices = @transform_0, window_bounds = array<i64: 3, 128>}, {transform_indices = @transform_1, window_bounds = array<i64: 27, 128>}]} {
    %c0 = arith.constant 0 : index
    %c0_0 = arith.constant 0 : index
    %0 = vector.load %arg1[%c0, %c0_0] : memref<3x128xf32, #tpu.memory_space<vmem>>, vector<3x128xf32>
    %cst = arith.constant 1.000000e+00 : f32
    %1 = vector.broadcast %cst : f32 to vector<3x128xf32>
    %2 = arith.mulf %0, %1 : vector<3x128xf32>
    %cst_1 = arith.constant 2.000000e+00 : f32
    %3 = vector.broadcast %cst_1 : f32 to vector<3x128xf32>
    %4 = arith.mulf %0, %3 : vector<3x128xf32>
    %cst_2 = arith.constant 4.000000e+00 : f32
    %5 = vector.broadcast %cst_2 : f32 to vector<3x128xf32>
    %6 = arith.mulf %0, %5 : vector<3x128xf32>
    %cst_3 = arith.constant 8.000000e+00 : f32
    %7 = vector.broadcast %cst_3 : f32 to vector<3x128xf32>
    %8 = arith.mulf %0, %7 : vector<3x128xf32>
    %9 = tpu.concatenate %2, %4, %6, %8 in 0 : vector<3x128xf32>, vector<3x128xf32>, vector<3x128xf32>, vector<3x128xf32> -> vector<12x128xf32>
    %10 = math.sin %9 : vector<12x128xf32>
    %11 = math.cos %9 : vector<12x128xf32>
    %12 = tpu.concatenate %0, %10, %11 in 0 : vector<3x128xf32>, vector<12x128xf32>, vector<12x128xf32> -> vector<27x128xf32>
    %c0_4 = arith.constant 0 : index
    %c0_5 = arith.constant 0 : index
    %13 = vector.load %arg2[%c0_4, %c0_5] : memref<27x128xf32, #tpu.memory_space<vmem>>, vector<27x128xf32>
    tpu.vector_store %arg2[%c0_4, %c0_5], %12 {strides = array<i32>} : memref<27x128xf32, #tpu.memory_space<vmem>>, vector<27x128xf32>,
    return
  }
  func.func @transform_0(%arg0: i32) -> (i32, i32) {
    %c0_i32 = arith.constant 0 : i32
    %c0_i32_0 = arith.constant 0 : i32
    return %c0_i32, %arg0 : i32, i32
  }
  func.func @transform_1(%arg0: i32) -> (i32, i32) {
    %c0_i32 = arith.constant 0 : i32
    %c0_i32_0 = arith.constant 0 : i32
    return %c0_i32, %arg0 : i32, i32
  }
}

</mosaic_0001>

<bundles_post_ra>
// kernel: tpu_custom_call.1
= control target key start
LH: loop header
LB: loop body
LE: loop exit
PB: predicated region body
PF: predicated region fallthrough
CT: control target
= control target key end

     0   :  { %6 = vsyncpa [#allocation3], 0  ;;  %s718_s0 = inlined_call_operand.hbm [shape: f32[3,128], index: 0, kind: input, shape index: {}]   ;;  %s719_s1 = inlined_call_operand.hbm [shape: f32[27,128], index: 1, kind: output, shape index: {}]  }
   0x1   :  { %7 = vsyncpa [#allocation4], 0  ;;  %s583_s6 = smov [#allocation2]   ;;  %s535_s10 = scalar_lea.hbm %s718_s0, 64 }
   0x2   :  { %s14_s7 = sshll.u32 %s583_s6, 4  ;;  %p536_p0 = scmp.ne.s32.totalorder %s718_s0, %s535_s10  ;;  %s15_s7 = int_to_ptr.vmem [resolvable:$true] %s14_s7 }
   0x3   :  { %p539_p1 = scmp.lt.u32.totalorder %s535_s10, %s718_s0 }
   0x5   :  { %p541_p2 = pnand %p539_p1, %p536_p0 }
   0x7   :  { %544 = shalt.err (!%p541_p2)
}
   0x8   :  { %s545_s15 = scalar_lea.vmem %s15_s7, 64  ;;  %p550_p4 = scmp.lt.s32.totalorder %s15_s7, %s15_s7 }
   0x9   :  { %p546_p3 = scmp.ne.s32.totalorder %s15_s7, %s545_s15  ;;  %p551_p5 = scmp.lt.s32.totalorder %s545_s15, %s545_s15 }
   0xb   :  { %p552_p6 = por %p551_p5, %p550_p4 }
   0xd   :  { %p553_p7 = pnand %p552_p6, %p546_p3 }
   0xf   :  { %556 = shalt.err (!%p553_p7)
}
  0x10   :  { %17 = dma.hbm_to_vmem [thread:$0]  %s718_s0, 64, %s15_s7, [#allocation3]  }
  0x11   :  { %579 = dma.done.wait [#allocation3], 64  }
  0x12   :  { %580 = vsyncadd [#allocation3], 4294967232  ;;  %v615_v0 = vld [vmem:[#allocation2] sm:$0x7]  ;;  %vm34_vm0 = vcmask 1042432   ;;  %vm38_vm1 = vcmask 1040384  }
  0x13   :  { %v22_v1 = vmul.f32 2.0, %v615_v0  ;;  %v23_v2 = vmul.f32 4.0, %v615_v0  ;;  %v24_v3 = vmul.f32 8.0, %v615_v0  ;;  %vm36_vm2 = vcmask 1045504   ;;  %s590_s0 = smov [#allocation5]  }
  0x14   :  { %v584_v32 = vmov 683565275   ;;  %v585_v34 = vmov 2475754826   ;;  %v586_v39 = vmov 2131351028  }
  0x15   :  { %v26_v4 = vrot.slane %v22_v1, 5  ;;  %v29_v5 = vrot.slane %v23_v2, 2  ;;  %v32_v6 = vrot.slane %v24_v3, 7  ;;  %v587_v41 = vmov 2102212464   ;;  %s481_s18 = sshll.u32 %s590_s0, 4  ;;  %s482_s18 = int_to_ptr.vmem [resolvable:$true] %s481_s18 }
  0x16   :  { %v588_v43 = vmov 920167782   ;;  %v589_v51 = vmov 1326507024   ;;  %s557_s19 = scalar_lea.vmem %s482_s18, 512  ;;  %p562_p9 = scmp.lt.s32.totalorder %s482_s18, %s482_s18 }
  0x17   :  { %v35_v7 = vsel %vm34_vm0, %v615_v0, %v26_v4  ;;  %v622_v8 = vsel %vm38_vm1, %v29_v5, %v32_v6  ;;  %p558_p8 = scmp.ne.s32.totalorder %s482_s18, %s557_s19  ;;  %p563_p10 = scmp.lt.s32.totalorder %s557_s19, %s557_s19 }
  0x18   :  { %v624_v9 = vsel %vm36_vm2, %v35_v7, %v29_v5  ;;  %v147_v10 = vand.u32 2139095040, %v622_v8  ;;  %v144_v16 = vand.u32 2147483647, %v622_v8 }
  0x19   :  { %v40_v11 = vand.u32 2147483647, %v624_v9  ;;  %v43_v12 = vand.u32 2139095040, %v624_v9  ;;  %vm42_vm2 = vcmp.lt.s32.totalorder %v624_v9, 0  ;;  %p564_p11 = por %p563_p10, %p562_p9 }
  0x1a   :  { %v148_v13 = vshrl.u32 %v147_v10, 23  ;;  %v634_v22 = vand.u32 8388607, %v144_v16 }
  0x1b   :  { %v44_v14 = vshrl.u32 %v43_v12, 23  ;;  %v47_v15 = vand.u32 8388607, %v40_v11  ;;  %p565_p12 = pnand %p564_p11, %p558_p8 }
  0x1c   :  { %v497_v17 = vadd.s32 4294967169, %v148_v13  ;;  %v152_v29 = vor.u32 8388608, %v634_v22 }
  0x1d   :  { %v493_v18 = vadd.s32 4294967169, %v44_v14  ;;  %v48_v20 = vor.u32 8388608, %v47_v15 }
  0x1e   :  { %v154_v19 = vadd.s32 1, %v497_v17 }
  0x1f   :  { %v50_v21 = vadd.s32 1, %v493_v18  ;;  %v636_v28 = vshll.u32 %v48_v20, 8 }
  0x20   :  { %vm155_vm3 = vcmp.gt.s32.totalorder %v154_v19, 0 }
  0x21   :  { %vm51_vm4 = vcmp.gt.s32.totalorder %v50_v21, 0  ;;  %v156_v23 = vsel %vm155_vm3, %v154_v19, 0  ;;  %vm41_vm3 = vcmp.le.f32.partialorder %v40_v11, 0.7853982 }
  0x22   :  { %v52_v24 = vsel %vm51_vm4, %v50_v21, 0  ;;  %v158_v25 = vand.u32 31, %v156_v23  ;;  %v639_v30 = vshrl.u32 %v156_v23, 5  ;;  %vm146_vm4 = vcmp.lt.s32.totalorder %v622_v8, 0 }
  0x23   :  { %v53_v26 = vshrl.u32 %v52_v24, 5  ;;  %v54_v27 = vand.u32 31, %v52_v24 }
  0x24   :  { %v159_v31 = vsub.s32 32, %v158_v25  ;;  %v161_v33 = vshll.u32 %v584_v32, %v158_v25  ;;  %v164_v35 = vshll.u32 %v585_v34, %v158_v25  ;;  %v167_v45 = vshll.u32 %v586_v39, %v158_v25 }
  0x25   :  { %v55_v36 = vsub.s32 32, %v54_v27  ;;  %v57_v37 = vshll.u32 %v584_v32, %v54_v27  ;;  %v60_v38 = vshll.u32 %v585_v34, %v54_v27  ;;  %v63_v40 = vshll.u32 %v586_v39, %v54_v27 }
  0x26   :  { %v66_v42 = vshll.u32 %v587_v41, %v54_v27  ;;  %v69_v44 = vshll.u32 %v588_v43, %v54_v27  ;;  %vm72_vm5 = vcmp.lt.s32.totalorder %v53_v26, 1  ;;  %vm73_vm6 = vcmp.lt.s32.totalorder %v53_v26, 2 }
  0x27   :  { %v56_v46 = vshrl.u32 %v584_v32, %v55_v36  ;;  %v58_v47 = vshrl.u32 %v585_v34, %v55_v36  ;;  %v61_v48 = vshrl.u32 %v586_v39, %v55_v36  ;;  %v64_v49 = vshrl.u32 %v587_v41, %v55_v36 }
  0x28   :  { %v67_v50 = vshrl.u32 %v588_v43, %v55_v36  ;;  %v70_v52 = vshrl.u32 %v589_v51, %v55_v36  ;;  %vm74_vm7 = vcmp.lt.s32.totalorder %v53_v26, 3  ;;  %vm75_vm8 = vcmp.lt.s32.totalorder %v53_v26, 4 }
  0x29   :  { %v59_v53 = vor.u32 %v58_v47, %v57_v37  ;;  %v62_v54 = vor.u32 %v61_v48, %v60_v38  ;;  %v65_v55 = vor.u32 %v64_v49, %v63_v40  ;;  %v162_v58 = vshrl.u32 %v585_v34, %v159_v31 }
  0x2a   :  { %v68_v56 = vor.u32 %v67_v50, %v66_v42  ;;  %v71_v57 = vor.u32 %v70_v52, %v69_v44  ;;  %v165_v59 = vshrl.u32 %v586_v39, %v159_v31  ;;  %v160_v4 = vshrl.u32 %v584_v32, %v159_v31 }
  0x2b   :  { %v76_v60 = vsel %vm72_vm5, %v56_v46, %v59_v53  ;;  %v77_v61 = vsel %vm75_vm8, %v65_v55, 2102212464  ;;  %v80_v62 = vsel %vm72_vm5, %v59_v53, %v62_v54  ;;  %v84_v63 = vsel %vm72_vm5, %v62_v54, %v65_v55 }
  0x2c   :  { %v78_v1 = vsel %vm74_vm7, %v62_v54, %v77_v61  ;;  %v81_v2 = vsel %vm75_vm8, %v68_v56, 920167782  ;;  %v85_v3 = vsel %vm75_vm8, %v71_v57, 1326507024  ;;  %v163_v10 = vor.u32 %v162_v58, %v161_v33 }
  0x2d   :  { %v79_v5 = vsel %vm73_vm6, %v76_v60, %v78_v1  ;;  %v82_v6 = vsel %vm74_vm7, %v65_v55, %v81_v2  ;;  %v86_v7 = vsel %vm74_vm7, %v68_v56, %v85_v3  ;;  %v166_v14 = vor.u32 %v165_v59, %v164_v35 }
  0x2e   :  { %v83_v12 = vsel %vm73_vm6, %v80_v62, %v82_v6  ;;  %v87_v13 = vsel %vm73_vm6, %v84_v63, %v86_v7  ;;  %v168_v15 = vshrl.u32 %v587_v41, %v159_v31  ;;  %v170_v22 = vshll.u32 %v587_v41, %v158_v25 }
  0x2f   :  { %v651_v17 = vmul.u32.u64.low %v636_v28, %v87_v13  ;;  %v652_v18 = vmul.u32.u64.high %v636_v28, %v87_v13, %v651_v17  ;;  %v655_v19 = vmul.u32.u64.low %v636_v28, %v83_v12  ;;  %v656_v20 = vmul.u32.u64.high %v636_v28, %v83_v12, %v655_v19 }
  0x30   :  { %v169_v21 = vor.u32 %v168_v15, %v167_v45  ;;  %v171_v23 = vshrl.u32 %v588_v43, %v159_v31  ;;  %v173_v24 = vshll.u32 %v588_v43, %v158_v25  ;;  %v95_v27 = vmul.u32 %v636_v28, %v79_v5 }
  0x31   :  { %v174_v32 = vshrl.u32 %v589_v51, %v159_v31  ;;  %vm176_vm9 = vcmp.lt.s32.totalorder %v639_v30, 1  ;;  %v192_v26 = vshll.u32 %v152_v29, 8  ;;  %vm177_vm10 = vcmp.lt.s32.totalorder %v639_v30, 2 }
  0x32   :  { %v172_v33 = vor.u32 %v171_v23, %v170_v22  ;;  %vm178_vm11 = vcmp.lt.s32.totalorder %v639_v30, 3  ;;  %vm179_vm12 = vcmp.lt.s32.totalorder %v639_v30, 4  ;;  %vm97_vm13 = vc.u32 %v652_v18, %v655_v19 }
  0x33   :  { %v98_v34 = vadd.s32 1, %v656_v20  ;;  %v175_v35 = vor.u32 %v174_v32, %v173_v24  ;;  %v184_v36 = vsel %vm176_vm9, %v163_v10, %v166_v14  ;;  %v180_v25 = vsel %vm176_vm9, %v160_v4, %v163_v10 }
  0x34   :  { %v181_v37 = vsel %vm179_vm12, %v169_v21, 2102212464  ;;  %v185_v28 = vsel %vm179_vm12, %v172_v33, 920167782  ;;  %v188_v31 = vsel %vm176_vm9, %v166_v14, %v169_v21  ;;  %v96_v2 = vadd.s32 %v655_v19, %v652_v18 }
  0x35   :  { %v99_v38 = vsel %vm97_vm13, %v98_v34, %v656_v20  ;;  %v182_v29 = vsel %vm178_vm11, %v166_v14, %v181_v37  ;;  %v186_v39 = vsel %vm178_vm11, %v169_v21, %v185_v28  ;;  %v189_v40 = vsel %vm179_vm12, %v175_v35, 1326507024 }
  0x36   :  { %v100_v41 = vadd.s32 %v99_v38, %v95_v27  ;;  %v187_v42 = vsel %vm177_vm10, %v184_v36, %v186_v39  ;;  %v190_v43 = vsel %vm178_vm11, %v172_v33, %v189_v40  ;;  %v183_v44 = vsel %vm177_vm10, %v180_v25, %v182_v29 }
  0x37   :  { %v191_v45 = vsel %vm177_vm10, %v188_v31, %v190_v43  ;;  %v678_v46 = vmul.u32.u64.low %v192_v26, %v187_v42  ;;  %v679_v47 = vmul.u32.u64.high %v192_v26, %v187_v42, %v678_v46  ;;  %v199_v52 = vmul.u32 %v192_v26, %v183_v44 }
  0x38   :  { %v101_v48 = vadd.s32 536870912, %v100_v41  ;;  %v681_v49 = vmul.u32.u64.low %v192_v26, %v191_v45  ;;  %v682_v50 = vmul.u32.u64.high %v192_v26, %v191_v45, %v681_v49  ;;  %vm145_vm5 = vcmp.le.f32.partialorder %v144_v16, 0.7853982 }
  0x39   :  { %v202_v53 = vadd.s32 1, %v679_v47  ;;  %vm132_vm11 = vweird.f32 %v624_v9 }
  0x3a   :  { %v102_v51 = vshrl.u32 %v101_v48, 30  ;;  %vm201_vm14 = vc.u32 %v682_v50, %v678_v46  ;;  %v200_v23 = vadd.s32 %v678_v46, %v682_v50 }
  0x3b   :  { %v203_v55 = vsel %vm201_vm14, %v202_v53, %v679_v47 }
  0x3c   :  { %v103_v54 = vshll.u32 %v102_v51, 30  ;;  %v204_v57 = vadd.s32 %v203_v55, %v199_v52  ;;  %v126_v18 = vsub.s32 4, %v102_v51 }
  0x3e   :  { %v104_v56 = vsub.s32 %v100_v41, %v103_v54  ;;  %v205_v58 = vadd.s32 536870912, %v204_v57  ;;  %v127_v25 = vsel %vm42_vm2, %v126_v18, %v102_v51 }
  0x3f   :  { %v129_v29 = vsel %vm41_vm3, 0, %v127_v25 }
  0x40   :  { %v106_v30 = vsub.s32 0, %v104_v56  ;;  %v206_v60 = vshrl.u32 %v205_v58, 30  ;;  %v133_v43 = vadd.s32 3, %v129_v29  ;;  %v341_v50 = vand.u32 3, %v129_v29 }
  0x42   :  { %v494_v59 = vmin.u32 %v106_v30, %v104_v56  ;;  %v207_v62 = vshll.u32 %v206_v60, 30  ;;  %v230_v42 = vsub.s32 4, %v206_v60  ;;  %v134_v46 = vand.u32 3, %v133_v43 }
  0x43   :  { %vm343_vm9 = vcmp.eq.s32.totalorder %v341_v50, 0  ;;  %vm346_vm10 = vcmp.eq.s32.totalorder %v341_v50, 2  ;;  %vm342_vm12 = vcmp.lt.s32.totalorder %v341_v50, 2 }
  0x44   :  { %v108_v61 = vclz %v494_v59  ;;  %v208_v1 = vsub.s32 %v204_v57, %v207_v62  ;;  %v231_v45 = vsel %vm146_vm4, %v230_v42, %v206_v60  ;;  %vm139_vm6 = vcmp.eq.s32.totalorder %v134_v46, 2 }
  0x45   :  { %v233_v49 = vsel %vm145_vm5, 0, %v231_v45  ;;  %vm136_vm7 = vcmp.eq.s32.totalorder %v134_v46, 0  ;;  %vm135_vm8 = vcmp.lt.s32.totalorder %v134_v46, 2 }
  0x46   :  { %v495_v63 = vadd.s32 4294967294, %v108_v61  ;;  %v210_v4 = vsub.s32 0, %v208_v1  ;;  %v237_v54 = vadd.s32 3, %v233_v49  ;;  %v444_v57 = vand.u32 3, %v233_v49 }
  0x48   :  { %vm496_vm15 = vcmp.lt.s32.totalorder %v495_v63, 0  ;;  %v498_v10 = vmin.u32 %v210_v4, %v208_v1  ;;  %v238_v58 = vand.u32 3, %v237_v54  ;;  %vm449_vm14 = vcmp.eq.s32.totalorder %v444_v57, 2 }
  0x49   :  { %v111_v3 = vsel %vm496_vm15, 0, %v495_v63 }
  0x4a   :  { %v112_v5 = vsub.s32 32, %v111_v3  ;;  %v113_v6 = vshll.u32 %v104_v56, %v111_v3  ;;  %v116_v7 = vsub.s32 4294967266, %v111_v3  ;;  %v212_v14 = vclz %v498_v10 }
  0x4b   :  { %vm243_vm13 = vcmp.eq.s32.totalorder %v238_v58, 2  ;;  %vm240_vm15 = vcmp.eq.s32.totalorder %v238_v58, 0 }
  0x4c   :  { %v114_v12 = vshrl.u32 %v96_v2, %v112_v5  ;;  %v117_v13 = vadd.s32 127, %v116_v7  ;;  %v499_v20 = vadd.s32 4294967294, %v212_v14 }
  0x4e   :  { %v115_v15 = vor.u32 %v114_v12, %v113_v6  ;;  %v118_v17 = vshll.u32 %v117_v13, 23  ;;  %vm500_vm1 = vcmp.lt.s32.totalorder %v499_v20, 0 }
  0x4f   :  { %v215_v19 = vsel %vm500_vm1, 0, %v499_v20  ;;  %vm446_vm1 = vcmp.eq.s32.totalorder %v444_v57, 0 }
  0x50   :  { %v119_v21 = vor.u32 4788187, %v118_v17  ;;  %v122_v22 = vcvt.s32.f32 %v115_v15  ;;  %v216_v27 = vsub.s32 32, %v215_v19  ;;  %v217_v32 = vshll.u32 %v208_v1, %v215_v19 }
  0x51   :  { %v220_v26 = vsub.s32 4294967266, %v215_v19 }
  0x52   :  { %v120_v24 = vand.u32 2147483647, %v119_v21  ;;  %v218_v34 = vshrl.u32 %v200_v23, %v216_v27 }
  0x53   :  { %v221_v35 = vadd.s32 127, %v220_v26 }
  0x54   :  { %v123_v33 = vmul.f32 %v122_v22, %v120_v24  ;;  %v219_v37 = vor.u32 %v218_v34, %v217_v32 }
  0x55   :  { %v222_v28 = vshll.u32 %v221_v35, 23 }
  0x56   :  { %v124_v36 = vxor.u32 2147483648, %v123_v33  ;;  %v226_v40 = vcvt.s32.f32 %v219_v37 }
  0x57   :  { %v223_v39 = vor.u32 4788187, %v222_v28 }
  0x58   :  { %v125_v31 = vsel %vm42_vm2, %v124_v36, %v123_v33  ;;  %vm239_vm2 = vcmp.lt.s32.totalorder %v238_v58, 2 }
  0x59   :  { %v128_v38 = vsel %vm41_vm3, %v624_v9, %v125_v31  ;;  %v224_v41 = vand.u32 2147483647, %v223_v39  ;;  %vm445_vm3 = vcmp.lt.s32.totalorder %v444_v57, 2 }
  0x5a   :  { %527 = vcosq.f32 %v128_v38 }
  0x5b   :  { %529 = vsinq.f32 %v128_v38  ;;  %v227_v44 = vmul.f32 %v226_v40, %v224_v41 }
  0x5d   :  { %v228_v11 = vxor.u32 2147483648, %v227_v44 }
  0x5f   :  { %v229_v47 = vsel %vm146_vm4, %v228_v11, %v227_v44  ;;  %vm236_vm4 = vweird.f32 %v622_v8 }
  0x60   :  { %v232_v48 = vsel %vm145_vm5, %v622_v8, %v229_v47  ;;  %vm463_vm5 = vcmask 1046528  }
  0x61   :  { %531 = vcosq.f32 %v232_v48 }
  0x62   :  { %533 = vsinq.f32 %v232_v48 }
  0x64   :  { %v528_v51 = vpop.eup %527 }
  0x65   :  { %v530_v52 = vpop.eup %529  ;;  %v140_v53 = vxor.u32 2147483648, %v528_v51 }
  0x66   :  { %v137_v55 = vxor.u32 2147483648, %v530_v52 }
  0x67   :  { %v141_v16 = vsel %vm139_vm6, %v140_v53, %v530_v52  ;;  %v348_v60 = vsel %vm346_vm10, %v140_v53, %v530_v52 }
  0x68   :  { %v138_v56 = vsel %vm136_vm7, %v528_v51, %v137_v55  ;;  %v345_v59 = vsel %vm343_vm9, %v528_v51, %v137_v55 }
  0x69   :  { %v142_v30 = vsel %vm135_vm8, %v138_v56, %v141_v16  ;;  %v349_v63 = vsel %vm342_vm12, %v345_v59, %v348_v60 }
  0x6a   :  { %v143_v61 = vsel %vm132_vm11, nan, %v142_v30  ;;  %v350_v6 = vsel %vm132_vm11, nan, %v349_v63 }
  0x6b   :  { %v456_v62 = vrot.slane %v143_v61, 5  ;;  %v532_v1 = vpop.eup %531  ;;  %v464_v14 = vrot.slane %v350_v6, 1 }
  0x6c   :  { %v534_v3 = vpop.eup %533  ;;  %v244_v4 = vxor.u32 2147483648, %v532_v1 }
  0x6d   :  { %v470_v2 = vsel %vm34_vm0, %v615_v0, %v456_v62  ;;  %v241_v5 = vxor.u32 2147483648, %v534_v3 }
  0x6e   :  { %472 = vst [vmem:[#allocation5] sm:$0xff] %v470_v2  ;;  %v245_v7 = vsel %vm243_vm13, %v244_v4, %v534_v3  ;;  %v451_v10 = vsel %vm449_vm14, %v244_v4, %v534_v3 }
  0x6f   :  { %v242_v12 = vsel %vm240_vm15, %v532_v1, %v241_v5  ;;  %v448_v13 = vsel %vm446_vm1, %v532_v1, %v241_v5 }
  0x70   :  { %v246_v0 = vsel %vm239_vm2, %v242_v12, %v245_v7  ;;  %v452_v15 = vsel %vm445_vm3, %v448_v13, %v451_v10 }
  0x71   :  { %v247_v17 = vsel %vm236_vm4, nan, %v246_v0  ;;  %v453_v20 = vsel %vm236_vm4, nan, %v452_v15 }
  0x72   :  { %v457_v21 = vrot.slane %v247_v17, 5  ;;  %v465_v22 = vrot.slane %v453_v20, 1 }
  0x74   :  { %v458_v9 = vsel %vm34_vm0, %v456_v62, %v457_v21  ;;  %v466_v23 = vsel %vm463_vm5, %v464_v14, %v465_v22  ;;  %475 = vst [vmem:[#allocation5 + $0x18] sm:$0x7] %v465_v22 }
  0x75   :  { %v471_v8 = vsel %vm463_vm5, %v458_v9, %v464_v14  ;;  %474 = vst [vmem:[#allocation5 + $0x10] sm:$0xff] %v466_v23 }
  0x76   :  { %473 = vst [vmem:[#allocation5 + $0x8] sm:$0xff] %v471_v8 }
  0x77   :  { %568 = shalt.err (!%p565_p12)
}
  0x78   :  { %s569_s22 = scalar_lea.hbm %s719_s1, 512 }
  0x79   :  { %p570_p13 = scmp.ne.s32.totalorder %s719_s1, %s569_s22  ;;  %p573_p0 = scmp.lt.u32.totalorder %s569_s22, %s719_s1 }
  0x7b   :  { %p575_p1 = pnand %p573_p0, %p570_p13 }
  0x7d   :  { %578 = shalt.err (!%p575_p1)
}
  0x7e   :  { %s591_s27 = smov 128   ;;  %s592_s28 = smov 8  }
  0x7f   :  { %487 = dma.vmem_to_hbm [thread:$0]  %s482_s18, 512, %s719_s1, [#allocation4], %s591_s27, %s591_s27, %s592_s28  }
  0x80   :  { %581 = dma.done.wait [#allocation4], 512  }
  0x81   :  { %582 = vsyncadd [#allocation4], 4294966784 }
  0x82   :  { %491 = vsyncpa [#allocation3], 1 }
  0x83   :  { %492 = vsyncpa [#allocation4], 1 }

</bundles_post_ra>
